<compile_context>
chip_gen: v7x
topology: tpu7x:2x2x1
jax: 0.10.0
libtpu: 0.0.40
codegen_flags: <defaults>
</compile_context>

<pallas_src>
import functools

import jax
import jax.numpy as jnp
from jax.experimental import pallas as pl
from jax.experimental.pallas import tpu as pltpu


def _cdiv(a, b):
    return -(-a // b)


def _round_up(x, m):
    return _cdiv(x, m) * m


def _sublane_mult(dtype):
    # 32-bit -> 8 sublanes, 16-bit -> 16, 8-bit -> 32 (packed sublane tiling).
    return max(8, 32 // jnp.dtype(dtype).itemsize)


def _padded_bytes(rows, cols, dtype):
    # Layout-aware VMEM footprint of a (rows, cols) tile: last dim rounds up
    # to 128 lanes, second-to-last to the dtype sublane multiple.
    dt = jnp.dtype(dtype)
    return _round_up(rows, _sublane_mult(dt)) * _round_up(cols, 128) * dt.itemsize


def _physical_vmem_bytes():
    try:
        info = pltpu.get_tpu_info()
        cap = int(getattr(info, "vmem_capacity_bytes", 0))
        if cap > 0:
            return cap
    except Exception:
        pass
    return 64 * 1024 * 1024  # conservative fallback (v7x per-TC VMEM)


def _vmem_estimate_bytes(tn, n, c, l_dtype, f_dtype, compute_dtype):
    rows_pad = _cdiv(n, tn) * tn
    l_buf = 2 * _padded_bytes(tn, n, l_dtype)        # double-buffered L row tile
    f_buf = 2 * _padded_bytes(n, c, f_dtype)         # double-buffered feats block
    scratch = (_padded_bytes(rows_pad, c, jnp.float32)      # f32 normalized feats
               + _padded_bytes(n, c, compute_dtype)         # MXU-RHS normalized feats
               + _padded_bytes(tn, c, jnp.float32))         # running accumulator
    return l_buf + f_buf + scratch


def _pick_row_tile(n, c, l_dtype, f_dtype, compute_dtype, budget):
    sub = _sublane_mult(l_dtype)
    n_pad = _round_up(n, sub)
    cands = list(range(sub, n_pad + 1, sub))
    fits = [t for t in cands
            if _vmem_estimate_bytes(t, n, c, l_dtype, f_dtype, compute_dtype) <= budget]
    if not fits:
        return sub
    # Fewest row steps (largest tiles, fewest ~0.35us grid steps), then the
    # smallest such tile (least padded-tail waste).
    fits.sort(key=lambda t: (_cdiv(n, t), t))
    return fits[0]


def _dirichlet_kernel(feats_ref, l_ref, out_ref, f_scratch, fc_scratch, acc_ref,
                      *, normalize, compute_dtype, tn, n_valid, mask_tail):
    # feats_ref:  (1, N, C)       full per-batch features (one DMA per batch)
    # l_ref:      (1, TN, N)      row tile of the Laplacian
    # out_ref:    (1, 1, 1, 1)    per-(batch, split) partial sum
    # f_scratch:  (rows_pad, C)   f32 normalized feats (zero-padded tail rows)
    # fc_scratch: (N, C)          normalized feats pre-cast to compute_dtype (MXU RHS)
    # acc_ref:    (TN, C) f32     running accumulator of f ⊙ (L_rows @ f)
    h = pl.program_id(1)
    r = pl.program_id(2)
    nr = pl.num_programs(2)

    @pl.when(r == 0)
    def _():
        f = feats_ref[0].astype(jnp.float32)                          # (N, C)
        if normalize:
            # F.normalize(p=2, dim=-1): v / max(||v||, 1e-12)
            #   == v * rsqrt(max(||v||^2, 1e-24))   (rsqrt -> EUP slot)
            sumsq = jnp.sum(f * f, axis=-1, keepdims=True)
            f = f * jax.lax.rsqrt(jnp.maximum(sumsq, 1e-24))
        if mask_tail:
            f_scratch[...] = jnp.zeros_like(f_scratch)
            f_scratch[0:n_valid, :] = f
        else:
            f_scratch[...] = f
        fc_scratch[...] = f.astype(compute_dtype)   # cast once per batch, not per step
        acc_ref[...] = jnp.zeros_like(acc_ref)

    lap = l_ref[0]                                                    # (TN, N)
    if lap.dtype != jnp.dtype(compute_dtype):
        lap = lap.astype(compute_dtype)
    lf = jnp.dot(lap, fc_scratch[...],
                 preferred_element_type=jnp.float32)                  # (TN, C)

    start = pl.multiple_of((h * nr + r) * tn, 8)
    f_rows = f_scratch[pl.ds(start, tn), :]                           # (TN, C) f32
    contrib = f_rows * lf
    if mask_tail:
        row_idx = start + jax.lax.broadcasted_iota(jnp.int32, contrib.shape, 0)
        contrib = jnp.where(row_idx < n_valid, contrib, 0.0)
    acc_ref[...] = acc_ref[...] + contrib

    @pl.when(r == nr - 1)
    def _():
        out_ref[...] = jnp.sum(acc_ref[...]).reshape(1, 1, 1, 1)


def dirichlet_loss(feats, L, evecs=None, evals=None, mass=None, *,
                   normalize=True, compute_dtype=jnp.bfloat16,
                   row_tile=None, row_splits=None, l_buffer_count=2):
    """Pallas TPU implementation of DirichletLoss.forward.

    Store L (and feats) narrow upstream (bf16 / int8 / fp8) to cut the dominant
    HBM stream; compute_dtype only controls the MXU operand dtype (f32 accum).
    """
    del evecs, evals, mass  # unused by the reference forward pass
    B, N, C = feats.shape
    assert L.shape == (B, N, N), (L.shape, (B, N, N))

    l_dtype = jnp.dtype(L.dtype)
    f_dtype = jnp.dtype(feats.dtype)
    compute_dtype = jnp.dtype(compute_dtype)
    sub = _sublane_mult(l_dtype)

    cap = _physical_vmem_bytes()
    budget = int(cap * 0.75)                  # ~48 MiB on v7x, ~96 MiB on v5e/v6e

    if row_tile is None:
        tn = _pick_row_tile(N, C, l_dtype, f_dtype, compute_dtype, budget)
    else:
        tn = int(row_tile)
        assert tn >= sub and tn % sub == 0, (
            f"row_tile must be a multiple of the L sublane tile ({sub}) for {l_dtype}")

    row_steps = _cdiv(N, tn)
    rows_pad = row_steps * tn
    mask_tail = rows_pad != N

    if row_splits is None:
        # Keep both v7x TensorCores busy when the batch axis alone cannot.
        row_splits = 2 if (B == 1 and row_steps % 2 == 0 and row_steps >= 2) else 1
    else:
        row_splits = int(row_splits)
        assert row_splits >= 1 and row_steps % row_splits == 0, (
            f"row_splits={row_splits} must divide row_steps={row_steps}")
    steps_per_split = row_steps // row_splits

    vmem_est = _vmem_estimate_bytes(tn, N, C, l_dtype, f_dtype, compute_dtype)
    vmem_limit = int(min(cap * 0.85,          # never request more than physical VMEM
                         max(32 * 1024 * 1024, vmem_est * 1.25 + (2 << 20))))

    kernel = functools.partial(
        _dirichlet_kernel, normalize=normalize, compute_dtype=compute_dtype,
        tn=tn, n_valid=N, mask_tail=mask_tail)

    cost = pl.CostEstimate(
        flops=2 * B * N * N * C + 3 * B * N * C,
        transcendentals=B * N * row_splits if normalize else 0,
        bytes_accessed=(B * N * N * l_dtype.itemsize
                        + B * N * C * f_dtype.itemsize + B * row_splits * 4))

    l_spec_kwargs = {}
    if l_buffer_count > 2:
        # Deeper buffering only pays off when VMEM constraints force tiny TN;
        # prefer growing TN via the per-generation budget first.
        l_spec_kwargs["pipeline_mode"] = pl.Buffered(int(l_buffer_count))

    per_part = pl.pallas_call(
        kernel,
        out_shape=jax.ShapeDtypeStruct((B, row_splits, 1, 1), jnp.float32),
        grid_spec=pltpu.PrefetchScalarGridSpec(
            num_scalar_prefetch=0,
            grid=(B, row_splits, steps_per_split),
            in_specs=[
                # feats block index is constant over (h, r): one DMA per batch.
                pl.BlockSpec((1, N, C), lambda b, h, r: (b, 0, 0)),
                # L row tile (the dominant HBM stream).
                pl.BlockSpec((1, tn, N),
                             lambda b, h, r: (b, h * steps_per_split + r, 0),
                             **l_spec_kwargs),
            ],
            out_specs=pl.BlockSpec((1, 1, 1, 1), lambda b, h, r: (b, h, 0, 0)),
            scratch_shapes=[
                pltpu.VMEM((rows_pad, C), jnp.float32),   # normalized feats (f32)
                pltpu.VMEM((N, C), compute_dtype),        # normalized feats (MXU RHS)
                pltpu.VMEM((tn, C), jnp.float32),         # running accumulator
            ]),
        compiler_params=pltpu.CompilerParams(
            dimension_semantics=("parallel", "parallel", "arbitrary"),
            vmem_limit_bytes=vmem_limit),
        cost_estimate=cost,
    )(feats, L)

    loss = jnp.sum(per_part) / float(B * C)
    return {"dirichlet": loss}


def _dirichlet_ref(feats, L, normalize=True, compute_dtype=jnp.float32):
    """Pure-JAX reference matching the PyTorch module (optionally mirroring the
    kernel's low-precision MXU operands, with f32 accumulation)."""
    f = feats.astype(jnp.float32)
    if normalize:
        nrm = jnp.sqrt(jnp.sum(f * f, axis=-1, keepdims=True))
        f = f / jnp.maximum(nrm, 1e-12)
    lf = jnp.einsum("bnm,bmc->bnc",
                    L.astype(compute_dtype), f.astype(compute_dtype),
                    preferred_element_type=jnp.float32)
    de = jnp.sum(f * lf, axis=1)  # (B, C)
    return jnp.mean(de)


if __name__ == "__main__":
    key = jax.random.PRNGKey(0)
    k1, k2, k3, k4, k5, k6, k7 = jax.random.split(key, 7)

    B, N, C = 2, 32, 8
    feats = jax.random.normal(k1, (B, N, C), dtype=jnp.float32)
    # Symmetric Laplacian-like dense matrix per batch.
    A = jax.random.normal(k2, (B, N, N), dtype=jnp.float32)
    L = 0.5 * (A + jnp.swapaxes(A, -1, -2))
    # Unused auxiliary inputs (kept for signature parity with the module).
    evecs = jax.random.normal(k3, (B, N, N), dtype=jnp.float32)
    evals = jax.random.normal(k4, (B, N), dtype=jnp.float32)
    mass = jnp.abs(jax.random.normal(k5, (B, N), dtype=jnp.float32))

    # 1) f32 MXU path (test/debug), forced row tiling exercising multi-step
    #    accumulation, checked against the exact PyTorch-semantics reference.
    out = dirichlet_loss(feats, L, evecs, evals, mass, normalize=True,
                         compute_dtype=jnp.float32, row_tile=8)
    got = jax.block_until_ready(out["dirichlet"])
    ref = _dirichlet_ref(feats, L, normalize=True)
    assert jnp.allclose(got, ref, rtol=1e-4, atol=1e-4), (got, ref)

    # 2) Production path: L stored bf16 *upstream* (halves the dominant HBM
    #    stream) + default bf16 MXU operands, auto tile selection; checked
    #    against a reference mirroring the same bf16 operands.
    L_bf16 = L.astype(jnp.bfloat16)
    out = dirichlet_loss(feats, L_bf16, evecs, evals, mass, normalize=True)
    got = jax.block_until_ready(out["dirichlet"])
    ref = _dirichlet_ref(feats, L_bf16, normalize=True,
                         compute_dtype=jnp.bfloat16)
    assert jnp.allclose(got, ref, rtol=1e-2, atol=1e-2), (got, ref)

    # 3) normalize=False branch, automatic row-tile selection.
    out = dirichlet_loss(feats, L, evecs, evals, mass, normalize=False,
                         compute_dtype=jnp.float32)
    got = jax.block_until_ready(out["dirichlet"])
    ref = _dirichlet_ref(feats, L, normalize=False)
    assert jnp.allclose(got, ref, rtol=1e-4, atol=1e-4), (got, ref)

    # 4) Row-split parallel axis (v7x megacore path for small B).
    out = dirichlet_loss(feats, L, evecs, evals, mass, normalize=True,
                         compute_dtype=jnp.float32, row_tile=8, row_splits=2)
    got = jax.block_until_ready(out["dirichlet"])
    ref = _dirichlet_ref(feats, L, normalize=True)
    assert jnp.allclose(got, ref, rtol=1e-4, atol=1e-4), (got, ref)

    # 5) Ragged N (masked tail row tile instead of a whole-(N,N) fallback).
    Nr = 20
    feats_r = jax.random.normal(k6, (B, Nr, C), dtype=jnp.float32)
    Ar = jax.random.normal(k7, (B, Nr, Nr), dtype=jnp.float32)
    Lr = 0.5 * (Ar + jnp.swapaxes(Ar, -1, -2))
    out = dirichlet_loss(feats_r, Lr, normalize=True,
                         compute_dtype=jnp.float32, row_tile=8)
    got = jax.block_until_ready(out["dirichlet"])
    ref = _dirichlet_ref(feats_r, Lr, normalize=True)
    assert jnp.allclose(got, ref, rtol=1e-4, atol=1e-4), (got, ref)

    print("KERNEL_OK")
</pallas_src>

<mosaic_0001>
module attributes {stable_mosaic.version = 11 : i64} {
  func.func @_dirichlet_kernel(%arg0: i32, %arg1: i32, %arg2: i32, %arg3: memref<1x32x8xf32, #tpu.memory_space<vmem>>, %arg4: memref<1x8x32xf32, #tpu.memory_space<vmem>>, %arg5: memref<1x1x1x1xf32, #tpu.memory_space<vmem>>, %arg6: memref<32x8xf32, #tpu.memory_space<vmem>>, %arg7: memref<32x8xf32, #tpu.memory_space<vmem>>, %arg8: memref<8x8xf32, #tpu.memory_space<vmem>>) attributes {dimension_semantics = [#tpu.dimension_semantics<parallel>, #tpu.dimension_semantics<parallel>, #tpu.dimension_semantics<arbitrary>], iteration_bounds = array<i64: 2, 1, 4>, scalar_prefetch = 0 : i64, scratch_operands = 3 : i64, tpu.core_type = #tpu.core_type<tc>, window_params = [{transform_indices = @transform_0, window_bounds = array<i64: 1, 32, 8>}, {transform_indices = @transform_1, window_bounds = array<i64: 1, 8, 32>}, {transform_indices = @transform_2, window_bounds = array<i64: 1, 1, 1, 1>}]} {
    %c0_i32 = arith.constant 0 : i32
    %0 = arith.cmpi eq, %arg2, %c0_i32 : i32
    %1 = arith.extui %0 : i1 to i32
    %c0_i32_0 = arith.constant 0 : i32
    %2 = arith.cmpi ne, %1, %c0_i32_0 : i32
    scf.if %2 {
      %c0_11 = arith.constant 0 : index
      %c0_12 = arith.constant 0 : index
      %c0_13 = arith.constant 0 : index
      %20 = vector.load %arg3[%c0_11, %c0_12, %c0_13] : memref<1x32x8xf32, #tpu.memory_space<vmem>>, vector<1x32x8xf32>
      %21 = vector.shape_cast %20 : vector<1x32x8xf32> to vector<32x8xf32>
      %22 = arith.mulf %21, %21 : vector<32x8xf32>
      %cst_14 = arith.constant dense<0.000000e+00> : vector<32xf32>
      %23 = vector.multi_reduction <add>, %22, %cst_14 [1] : vector<32x8xf32> to vector<32xf32>
      %24 = vector.shape_cast %23 : vector<32xf32> to vector<32x1xf32>
      %cst_15 = arith.constant 1.000000e-24 : f32
      %25 = vector.broadcast %cst_15 : f32 to vector<32x1xf32>
      %26 = arith.maximumf %24, %25 : vector<32x1xf32>
      %27 = math.rsqrt %26 : vector<32x1xf32>
      %28 = vector.broadcast %27 : vector<32x1xf32> to vector<32x8xf32>
      %29 = arith.mulf %21, %28 : vector<32x8xf32>
      %c0_16 = arith.constant 0 : index
      %c0_17 = arith.constant 0 : index
      %30 = vector.load %arg6[%c0_16, %c0_17] : memref<32x8xf32, #tpu.memory_space<vmem>>, vector<32x8xf32>
      tpu.vector_store %arg6[%c0_16, %c0_17], %29 {strides = array<i32>} : memref<32x8xf32, #tpu.memory_space<vmem>>, vector<32x8xf32>,
      %c0_18 = arith.constant 0 : index
      %c0_19 = arith.constant 0 : index
      %31 = vector.load %arg7[%c0_18, %c0_19] : memref<32x8xf32, #tpu.memory_space<vmem>>, vector<32x8xf32>
      tpu.vector_store %arg7[%c0_18, %c0_19], %29 {strides = array<i32>} : memref<32x8xf32, #tpu.memory_space<vmem>>, vector<32x8xf32>,
      %cst_20 = arith.constant 0.000000e+00 : f32
      %32 = vector.broadcast %cst_20 : f32 to vector<8x8xf32>
      %c0_21 = arith.constant 0 : index
      %c0_22 = arith.constant 0 : index
      %33 = vector.load %arg8[%c0_21, %c0_22] : memref<8x8xf32, #tpu.memory_space<vmem>>, vector<8x8xf32>
      tpu.vector_store %arg8[%c0_21, %c0_22], %32 {strides = array<i32>} : memref<8x8xf32, #tpu.memory_space<vmem>>, vector<8x8xf32>,
    } else {
    }
    %c0 = arith.constant 0 : index
    %c0_1 = arith.constant 0 : index
    %c0_2 = arith.constant 0 : index
    %3 = vector.load %arg4[%c0, %c0_1, %c0_2] : memref<1x8x32xf32, #tpu.memory_space<vmem>>, vector<1x8x32xf32>
    %4 = vector.shape_cast %3 : vector<1x8x32xf32> to vector<8x32xf32>
    %c0_3 = arith.constant 0 : index
    %c0_4 = arith.constant 0 : index
    %5 = vector.load %arg7[%c0_3, %c0_4] : memref<32x8xf32, #tpu.memory_space<vmem>>, vector<32x8xf32>
    %cst = arith.constant dense<0.000000e+00> : vector<8x8xf32>
    %6 = tpu.matmul %4, %5, %cst {dimension_numbers = #tpu.dot_dimension_numbers<[1], [0], [0], [1], [0, 0, 1, 1], [], []>} : vector<8x32xf32>, vector<32x8xf32>, vector<8x8xf32> -> vector<8x8xf32>
    %c4_i32 = arith.constant 4 : i32
    %7 = arith.muli %arg1, %c4_i32 : i32
    %8 = arith.addi %7, %arg2 : i32
    %c8_i32 = arith.constant 8 : i32
    %9 = arith.muli %8, %c8_i32 : i32
    %10 = tpu.assume_multiple %9, 8 : i32
    %11 = arith.index_cast %10 : i32 to index
    %c0_5 = arith.constant 0 : index
    %12 = vector.load %arg6[%11, %c0_5] : memref<32x8xf32, #tpu.memory_space<vmem>>, vector<8x8xf32>
    %13 = arith.mulf %12, %6 : vector<8x8xf32>
    %c0_6 = arith.constant 0 : index
    %c0_7 = arith.constant 0 : index
    %14 = vector.load %arg8[%c0_6, %c0_7] : memref<8x8xf32, #tpu.memory_space<vmem>>, vector<8x8xf32>
    %15 = arith.addf %14, %13 : vector<8x8xf32>
    %c0_8 = arith.constant 0 : index
    %c0_9 = arith.constant 0 : index
    %16 = vector.load %arg8[%c0_8, %c0_9] : memref<8x8xf32, #tpu.memory_space<vmem>>, vector<8x8xf32>
    tpu.vector_store %arg8[%c0_8, %c0_9], %15 {strides = array<i32>} : memref<8x8xf32, #tpu.memory_space<vmem>>, vector<8x8xf32>,
    %c3_i32 = arith.constant 3 : i32
    %17 = arith.cmpi eq, %arg2, %c3_i32 : i32
    %18 = arith.extui %17 : i1 to i32
    %c0_i32_10 = arith.constant 0 : i32
    %19 = arith.cmpi ne, %18, %c0_i32_10 : i32
    scf.if %19 {
      %c0_11 = arith.constant 0 : index
      %c0_12 = arith.constant 0 : index
      %20 = vector.load %arg8[%c0_11, %c0_12] : memref<8x8xf32, #tpu.memory_space<vmem>>, vector<8x8xf32>
      %21 = vector.shape_cast %20 : vector<8x8xf32> to vector<1x8x8xf32>
      %cst_13 = arith.constant dense<0.000000e+00> : vector<1xf32>
      %22 = vector.multi_reduction <add>, %21, %cst_13 [1, 2] : vector<1x8x8xf32> to vector<1xf32>
      %23 = vector.shape_cast %22 : vector<1xf32> to vector<1x1x1xf32>
      %24 = vector.extract %23[0, 0, 0] : f32 from vector<1x1x1xf32>
      %25 = vector.broadcast %24 : f32 to vector<1x1x1x1xf32>
      %c0_14 = arith.constant 0 : index
      %c0_15 = arith.constant 0 : index
      %c0_16 = arith.constant 0 : index
      %c0_17 = arith.constant 0 : index
      %26 = vector.load %arg5[%c0_14, %c0_15, %c0_16, %c0_17] : memref<1x1x1x1xf32, #tpu.memory_space<vmem>>, vector<1x1x1x1xf32>
      tpu.vector_store %arg5[%c0_14, %c0_15, %c0_16, %c0_17], %25 {strides = array<i32>} : memref<1x1x1x1xf32, #tpu.memory_space<vmem>>, vector<1x1x1x1xf32>,
    } else {
    }
    return
  }
  func.func @transform_0(%arg0: i32, %arg1: i32, %arg2: i32) -> (i32, i32, i32) {
    %c0_i32 = arith.constant 0 : i32
    %c0_i32_0 = arith.constant 0 : i32
    %c0_i32_1 = arith.constant 0 : i32
    return %arg0, %c0_i32, %c0_i32_0 : i32, i32, i32
  }
  func.func @transform_1(%arg0: i32, %arg1: i32, %arg2: i32) -> (i32, i32, i32) {
    %c4_i32 = arith.constant 4 : i32
    %0 = arith.muli %arg1, %c4_i32 : i32
    %1 = arith.addi %0, %arg2 : i32
    %c0_i32 = arith.constant 0 : i32
    %c0_i32_0 = arith.constant 0 : i32
    return %arg0, %1, %c0_i32 : i32, i32, i32
  }
  func.func @transform_2(%arg0: i32, %arg1: i32, %arg2: i32) -> (i32, i32, i32, i32) {
    %c0_i32 = arith.constant 0 : i32
    %c0_i32_0 = arith.constant 0 : i32
    %c0_i32_1 = arith.constant 0 : i32
    return %arg0, %arg1, %c0_i32, %c0_i32_0 : i32, i32, i32, i32
  }
}

</mosaic_0001>

<bundles_post_ra>
// kernel: tpu_custom_call.1
= control target key start
LH: loop header
LB: loop body
LE: loop exit
PB: predicated region body
PF: predicated region fallthrough
CT: control target
= control target key end

     0   :  { %s609_s9 = smov 0   ;;  %s611_s10 = smov 0   ;;  %s696_s0 = inlined_call_operand.vmem [shape: f32[2,32,8], index: 0, kind: input, shape index: {}]   ;;  %s697_s1 = inlined_call_operand.vmem [shape: f32[2,32,32], index: 1, kind: input, shape index: {}]   ;;  %s698_s2 = inlined_call_operand.vmem [shape: f32[2,1,1,1], index: 2, kind: output, shape index: {}]  }
   0x1   :  { %s613_s11 = smov 0   ;;  %s615_s12 = smov 0  }
   0x2   :  { %s617_s13 = smov 0  }
   0x3 LB: > { %s24_s14 = sadd.s32 1, %s580_s11  ;;  %s31_s15 = sadd.s32 1, %s584_s12  ;;  %s588_s13 = sphi %s617_s13, %s12_s13   ;;  %s584_s12 = sphi %s615_s12, %s702_s12   ;;  %s580_s11 = sphi %s613_s11, %s701_s11   ;;  %s576_s10 = sphi %s611_s10, %s700_s10   ;;  %s572_s9 = sphi %s609_s9, %s699_s9  }
   0x4   : > { %p25_p0 = scmp.ge.s32.totalorder %s24_s14, 4  ;;  %p462_p1 = scmp.ge.s32.totalorder %s588_s13, 1 }
   0x5   : > { %p156_p2 = scmp.lt.s32.totalorder %s588_s13, 9 }
   0x6   : > { %s704_s14 = smov (%p25_p0, %s24_s14), 0  ;;  %s706_s15 = smov (!%p25_p0, %s31_s15), %s584_s12 }
   0x7   : > { %p157_p3 = pnand %p462_p1, %p156_p2  ;;  %p33_p4 = scmp.ge.s32.totalorder %s706_s15, 2 }
   0x8   : > { %p189_p5 = scmp.lt.s32.totalorder (!%p157_p3), %s576_s10, 1  ;;  %p198_p6 = scmp.lt.s32.totalorder (!%p157_p3), %s572_s9, 3 }
   0x9   : > { %s708_s15 = smov (%p33_p4, %s706_s15), 0  ;;  %160 = sbr.rel (%p157_p3) target bundleno = 634 (0x27a), region = 28 }
   0xa   : > { %p467_p7 = scmp.ne.s32.totalorder (!%p157_p3), %s572_s9, 0 }
  0x10   : > { %s710_s10 = smov (!%p189_p5, %s576_s10), 1  ;;  %215 = sbr.rel (%p467_p7) target bundleno = 187 (0xbb), region = 32 }
  0x11   : > { %s199_s16 = scalar_select %p198_p6, %s572_s9, 3 }
  0x12   : > { %s473_s17 = sshll.u32 %s710_s10, 5  ;;  %s465_s18 = sshll.u32 %s710_s10, 2  ;;  %vm224_vm0 = vcmask (!%p467_p7), 64512   ;;  %v590_v4 = vmov (!%p467_p7), 0.0  }
  0x13   : > { %s193_s21 = scalar_lea.vmem %s696_s0, %s473_s17  ;;  %s201_s22 = sadd.s32 %s465_s18, %s199_s16  ;;  %257 = vst.msk [vmem:[#allocation4] sm:$0xff] (!%p467_p7), %vm224_vm0, %v590_v4 }
  0x14   : > { %s466_s23 = sshll.u32 %s201_s22, 3  ;;  %s211_s26 = scalar_lea.vmem %s698_s2, %s710_s10  ;;  %v218_v0 = vld [vmem:[%s193_s21 + $0x10] sm:$0xff] (!%p467_p7)  ;;  %v216_v1 = vld [vmem:[%s193_s21] sm:$0xff] (!%p467_p7)  ;;  %v219_v2 = vld [vmem:[%s193_s21 + $0x18] sm:$0xff] (!%p467_p7) }
  0x15   : > { %s657_s29 = scalar_lea.vmem %s697_s1, %s466_s23  ;;  %v222_v3 = vmul.f32 (!%p467_p7), %v218_v0, %v218_v0  ;;  %v220_v5 = vmul.f32 (!%p467_p7), %v216_v1, %v216_v1  ;;  %v223_v6 = vmul.f32 (!%p467_p7), %v219_v2, %v219_v2  ;;  %v217_v7 = vld [vmem:[%s193_s21 + $0x8] sm:$0xff] (!%p467_p7) }
  0x16   : > { %v221_v8 = vmul.f32 (!%p467_p7), %v217_v7, %v217_v7 }
  0x17   : > { %v231_v9 = vsel %vm224_vm0, %v222_v3, 0.0  ;;  %v225_v10 = vsel %vm224_vm0, %v220_v5, 0.0  ;;  %v234_v11 = vsel %vm224_vm0, %v223_v6, 0.0 }
  0x18   : > { %232 = vadd.xlane.f32.xlu1 %v231_v9  ;;  %226 = vadd.xlane.f32.xlu0 %v225_v10  ;;  %v228_v12 = vsel %vm224_vm0, %v221_v8, 0.0 }
  0x1c   : > { %235 = vadd.xlane.f32.xlu1 %v234_v11  ;;  %229 = vadd.xlane.f32.xlu0 %v228_v12 }
  0xa5   : > { %v233_v13 = vpop.xlane.xlu1 %232  ;;  %v227_v14 = vpop.xlane.xlu0 %226 }
  0xa6   : > { %v239_v15 = vmax.f32 %v233_v13, 1e-24  ;;  %v237_v16 = vmax.f32 %v227_v14, 1e-24 }
  0xa8   : > { %542 = vrsqrt.f32 %v239_v15 }
  0xa9   : > { %544 = vrsqrt.f32 %v237_v16  ;;  %v236_v17 = vpop.xlane.xlu1 %235  ;;  %v230_v18 = vpop.xlane.xlu0 %229 }
  0xaa   : > { %v240_v19 = vmax.f32 %v236_v17, 1e-24  ;;  %v238_v20 = vmax.f32 %v230_v18, 1e-24 }
  0xac   : > { %546 = vrsqrt.f32 %v240_v19 }
  0xad   : > { %548 = vrsqrt.f32 %v238_v20 }
  0xb2   : > { %v543_v21 = vpop.eup %542 }
  0xb3   : > { %v545_v22 = vpop.eup %544  ;;  %v247_v23 = vmul.f32 %v543_v21, %v218_v0 }
  0xb4   : > { %v245_v24 = vmul.f32 %v545_v22, %v216_v1 }
  0xb5   : > { %251 = vst.msk [vmem:[#allocation2 + $0x10] sm:$0xff] %vm224_vm0, %v247_v23  ;;  %255 = vst.msk [vmem:[#allocation3 + $0x10] sm:$0xff] %vm224_vm0, %v247_v23 }
  0xb6   : > { %v547_v25 = vpop.eup %546  ;;  %249 = vst.msk [vmem:[#allocation2] sm:$0xff] %vm224_vm0, %v245_v24  ;;  %253 = vst.msk [vmem:[#allocation3] sm:$0xff] %vm224_vm0, %v245_v24 }
  0xb7   : > { %v549_v26 = vpop.eup %548  ;;  %v248_v27 = vmul.f32 %v547_v25, %v219_v2 }
  0xb8   : > { %v246_v28 = vmul.f32 %v549_v26, %v217_v7 }
  0xb9   : > { %252 = vst.msk [vmem:[#allocation2 + $0x18] sm:$0xff] %vm224_vm0, %v248_v27  ;;  %256 = vst.msk [vmem:[#allocation3 + $0x18] sm:$0xff] %vm224_vm0, %v248_v27 }
  0xba   : > { %250 = vst.msk [vmem:[#allocation2 + $0x8] sm:$0xff] %vm224_vm0, %v246_v28  ;;  %254 = vst.msk [vmem:[#allocation3 + $0x8] sm:$0xff] %vm224_vm0, %v246_v28 }
  0xbb PF: > { %v591_v32 = vmov 0.0|0.0   ;;  %vm592_vm1 = vmmov 0   ;;  %v593_v35 = vmov 0.0   ;;  %v258_v37 = vld [vmem:[%s657_s29] sm:$0xff]  ;;  %vm263_vm2 = vcmask 261120   ;;  %s469_s30 = sshll.u32 %s572_s9, 3 }
  0xbc   : > { %v261_v31 = vld [vmem:[#allocation3 + $0x10] sm:$0xff]  ;;  %490 = vmatprep.subr.bf16.mxu0 %v591_v32  ;;  %487 = vmatprep.mubr.msk.f32.mxu0 %vm592_vm1, %v593_v35  ;;  %s340_s3 = scalar_lea.vmem [#allocation2], %s469_s30  ;;  %vm345_vm3 = vcmask 64512   ;;  %p470_p8 = scmp.ne.s32.totalorder %s572_s9, 3 }
  0xbd   : > { %v259_v29 = vld [vmem:[#allocation3] sm:$0xff]  ;;  %vm363_vm4 = vcmask (!%p470_p8), 0  }
  0xbe   : > { %v343_v40 = vld [vmem:[#allocation4] sm:$0xff] }
  0xc0   : > { %v262_v34 = vld [vmem:[#allocation3 + $0x18] sm:$0xff] }
  0xc1   : > { %v260_v30 = vld [vmem:[#allocation3 + $0x8] sm:$0xff]  ;;  %v494_v36 = vpack.c.bf16 %v262_v34, %v261_v31  ;;  %v341_v38 = vld [vmem:[%s340_s3] sm:$0xff] }
  0xc2   : > { %v491_v33 = vpack.c.bf16 %v260_v30, %v259_v29 }
  0xc4   : > { %492 = vmatpush3.bf16.msra.mxu0 %v491_v33 }
  0xc5   : > { %493 = vmatprep.subr.bf16.mxu0 %v591_v32 }
  0xc8   : > { %495 = vmatpush3.bf16.msra.mxu0 %v494_v36 }
  0xcb   : > { %488 = vmatmul.mubr.msk.f32.vlgmr.msra.gmra.mrb[0].mxu0 %vm263_vm2, %v258_v37 }
 0x19d   : > { %350 = sbr.rel (%p470_p8) target bundleno = 634 (0x27a), region = 36 }
 0x19e   : > { %v333_v39 = vpop.f32.mrb[0].mxu0 }
 0x19f   : > { %v342_v41 = vmul.f32 %v341_v38, %v333_v39  ;;  %v489_v42 = vpop.f32.mrb[1].mxu0 }
 0x1a1   : > { %v344_v43 = vadd.f32 %v343_v40, %v342_v41 }
 0x1a3   : > { %346 = vst.msk [vmem:[#allocation4] sm:$0xff] %vm345_vm3, %v344_v43 }
 0x1aa   : > { %v351_v44 = vld [vmem:[#allocation4] sm:$0xff] }
 0x1ab   : > { %v352_v45 = vsel %vm345_vm3, %v351_v44, 0.0 }
 0x1ac   : > { %353 = vadd.xlane.f32.xlu0 %v352_v45 }
 0x239   : > { %v354_v46 = vpop.xlane.xlu0 %353 }
 0x23a   : > { %v355_v47 = vrot.slane %v354_v46, 4 }
 0x23c   : > { %v356_v48 = vadd.f32 %v355_v47, %v354_v46 }
 0x23e   : > { %v357_v49 = vrot.slane %v356_v48, 2 }
 0x240   : > { %v358_v50 = vadd.f32 %v357_v49, %v356_v48 }
 0x242   : > { %v359_v51 = vrot.slane %v358_v50, 1 }
 0x244   : > { %v360_v52 = vadd.f32 %v359_v51, %v358_v50 }
 0x246   : > { %496 = vpush %v360_v52 }
 0x277   : > { %s497_s4 = spop %496 }
 0x278   : > { %v362_v53 = vstv %s497_s4 }
 0x279   : > { %364 = vst.msk [vmem:[%s211_s26] sm:$0x1] %vm363_vm4, %v362_v53 }
 0x27a PF: > { %s12_s13 = sadd.s32 1, %s588_s13   ;;  %s699_s9 = smov %s580_s11 }
 0x27b   : > { %p9_p9 = scmp.ge.s32.totalorder %s12_s13, 10   ;;  %s700_s10 = smov %s584_s12 }
 0x27c   : > { %s701_s11 = smov %s704_s14  ;;  %s702_s12 = smov %s708_s15 }
 0x27d   :  { %11 = sbr.rel (!%p9_p9) target bundleno = 3 (0x3), region = 70 }

</bundles_post_ra>
